<compile_context>
chip_gen: v7x
topology: tpu7x:2x2x1
jax: 0.10.0
libtpu: 0.0.40
codegen_flags: <defaults>
</compile_context>

<pallas_src>
import functools

import jax
import jax.numpy as jnp
from jax.experimental import pallas as pl
from jax.experimental.pallas import tpu as pltpu

# Stand-in for GlobalToolConfig.tool_token_start (constant offset).
TOOL_TOKEN_START = 100

_SUBLANES = 8  # sublane rows used for the dense id tile layout


def _cdiv(a, b):
    return -(-a // b)


def _round_up(a, b):
    return _cdiv(a, b) * b


def _tool_tokens_kernel(tok_ref, table_ref, out_ref, *, token_start, chunk):
    """One grid step: gather `block_rows` embedding rows via one-hot matmuls.

    tok_ref   : VMEM, (1, 8, cols) int32 ids, dense row-major layout
                (id for block-row b lives at [0, b // cols, b % cols]).
    table_ref : VMEM, (t_rows, E) embedding table (resident; constant index_map).
    out_ref   : VMEM, (block_rows, E) output tile (block_rows = 8 * cols).
    """
    t_rows = table_ref.shape[0]
    table = table_ref[...]
    ids_all = tok_ref[0] - token_start          # (8, cols) int32, one VPU pass
    sub, cols = ids_all.shape
    n_chunks = cols // chunk

    # Hoisted: sublane-iota over table rows (reused by every chunk).
    row_iota = jax.lax.broadcasted_iota(jnp.int32, (t_rows, chunk), 0)

    # Static double loop -> fully unrolled; all slices are compile-time constants.
    for s in range(sub):
        for j in range(n_chunks):
            ids = ids_all[s:s + 1, j * chunk:(j + 1) * chunk]        # (1, chunk)
            # Transposed one-hot: dense (t_rows, chunk) layout, pure VPU compare,
            # no lane->sublane movement of the ids.
            oh_t = (row_iota == ids).astype(table.dtype)             # (t_rows, chunk)
            # (chunk, E) = oh_t^T @ table on the MXU (exact: one nonzero per row).
            blk = jax.lax.dot_general(
                oh_t, table,
                dimension_numbers=(((0,), (0,)), ((), ())),
                preferred_element_type=jnp.float32)
            r0 = s * cols + j * chunk
            out_ref[r0:r0 + chunk, :] = blk.astype(out_ref.dtype)


def tool_tokens_forward(x, embedding_table, *, token_start=TOOL_TOKEN_START,
                        block_rows=8192, chunk_rows=256, use_pallas=None):
    """Pallas equivalent of ToolTokens.forward: table[x - token_start]."""
    orig_shape = x.shape
    flat = x.reshape(-1).astype(jnp.int32)
    n = int(flat.shape[0])
    t_rows, embed_dim = embedding_table.shape
    itemsize = jnp.dtype(embedding_table.dtype).itemsize

    if n == 0:
        return jnp.zeros((*orig_shape, embed_dim), embedding_table.dtype)

    # Small-n fast path: a pallas_call launch dwarfs a few-KiB gather.
    if use_pallas is None:
        use_pallas = n * embed_dim * itemsize >= (1 << 20)
    if not use_pallas:
        out = jnp.take(embedding_table, flat - token_start, axis=0)
        return out.reshape(*orig_shape, embed_dim)

    # ---- block sizing (generation-aware VMEM budget) -------------------------
    # Budget ~24 MiB for the double-buffered output tiles: comfortably inside
    # v7x's 64 MiB physical / 32 MiB default-scoped VMEM and v5e's limits.
    out_budget = 24 * 1024 * 1024
    cap = max(1024, out_budget // (2 * embed_dim * itemsize))
    block_rows = min(int(block_rows), cap)
    # Medium inputs: split into >= 2 blocks so a v7x "parallel" axis uses both TCs.
    if n <= block_rows:
        block_rows = max(1024, _round_up(_cdiv(n, 2), _SUBLANES))
    # Dense id-tile layout needs cols (= block_rows / 8) to be a lane multiple.
    block_rows = _round_up(block_rows, _SUBLANES * 128)
    cols = block_rows // _SUBLANES
    chunk = chunk_rows if (chunk_rows <= cols and cols % chunk_rows == 0) else 128

    num_blocks = _cdiv(n, block_rows)
    n_pad = num_blocks * block_rows

    # Lane-dense id layout: contiguous in HBM, dense (8, cols) int32 tile in VMEM.
    padded = jnp.pad(flat, (0, n_pad - n), constant_values=token_start)
    ids3 = padded.reshape(num_blocks, _SUBLANES, cols)

    kernel = functools.partial(_tool_tokens_kernel,
                               token_start=token_start, chunk=chunk)

    out_tile_bytes = block_rows * embed_dim * itemsize
    id_tile_bytes = block_rows * 4
    table_bytes = t_rows * embed_dim * itemsize
    vmem_limit = int(min(48 << 20,
                         max(32 << 20,
                             2 * (out_tile_bytes + id_tile_bytes)
                             + 2 * table_bytes + (4 << 20))))

    cost = pl.CostEstimate(
        flops=2 * n * t_rows * embed_dim,
        transcendentals=0,
        bytes_accessed=n * (embed_dim * itemsize + 4) + table_bytes)

    out = pl.pallas_call(
        kernel,
        out_shape=jax.ShapeDtypeStruct((n, embed_dim), embedding_table.dtype),
        grid_spec=pltpu.PrefetchScalarGridSpec(
            num_scalar_prefetch=0,
            grid=(num_blocks,),
            in_specs=[
                # Dense id tile for this step (contiguous 4*block_rows byte DMA).
                pl.BlockSpec((1, _SUBLANES, cols), lambda i: (i, 0, 0)),
                # Whole (tiny) embedding table, same block every step -> resident.
                pl.BlockSpec((t_rows, embed_dim), lambda i: (0, 0)),
            ],
            out_specs=pl.BlockSpec((block_rows, embed_dim), lambda i: (i, 0)),
        ),
        compiler_params=pltpu.CompilerParams(
            dimension_semantics=("parallel",),
            vmem_limit_bytes=vmem_limit),
        cost_estimate=cost,
    )(ids3, embedding_table)

    return out.reshape(*orig_shape, embed_dim)


if __name__ == "__main__":
    # Module config (small, consistent with ToolTokens.__init__).
    num_tools = 5
    embed_dim = 128                      # lane-aligned embedding width
    table_rows = num_tools + 3

    key = jax.random.PRNGKey(0)
    k_tab, k_x1, k_x2 = jax.random.split(key, 3)

    # Deterministic synthetic parameters (nn.Embedding weight analogue).
    embedding_table = (0.02 *
                       jax.random.normal(k_tab, (table_rows, embed_dim),
                                         dtype=jnp.float32))

    # Small input consistent with the module (batch=2, seq=8).
    x_small = jax.random.randint(k_x1, (2, 8),
                                 TOOL_TOKEN_START, TOOL_TOKEN_START + table_rows,
                                 dtype=jnp.int32)
    ref_small = embedding_table[x_small - TOOL_TOKEN_START]

    # Auto path (tiny stream -> plain-JAX fast path).
    out_small = jax.block_until_ready(tool_tokens_forward(x_small, embedding_table))
    assert out_small.shape == (2, 8, embed_dim)
    assert jnp.allclose(out_small, ref_small), "fast-path mismatch"

    # Force the Pallas kernel on the small input (exercises partial-block masking).
    out_small_k = jax.block_until_ready(
        tool_tokens_forward(x_small, embedding_table, use_pallas=True))
    assert jnp.allclose(out_small_k, ref_small), "kernel mismatch (small input)"

    # Larger stream: multiple grid steps, ragged tail, grid >= 2.
    x_big = jax.random.randint(k_x2, (3, 1500),
                               TOOL_TOKEN_START, TOOL_TOKEN_START + table_rows,
                               dtype=jnp.int32)
    out_big = jax.block_until_ready(tool_tokens_forward(x_big, embedding_table))
    ref_big = embedding_table[x_big - TOOL_TOKEN_START]
    assert out_big.shape == (3, 1500, embed_dim)
    assert jnp.allclose(out_big, ref_big), "kernel mismatch (large input)"

    print("KERNEL_OK")
</pallas_src>

<mosaic_0001>
module attributes {stable_mosaic.version = 11 : i64} {
  func.func @_tool_tokens_kernel(%arg0: i32, %arg1: memref<1x8x128xi32, #tpu.memory_space<vmem>>, %arg2: memref<8x128xf32, #tpu.memory_space<vmem>>, %arg3: memref<1024x128xf32, #tpu.memory_space<vmem>>) attributes {dimension_semantics = [#tpu.dimension_semantics<parallel>], iteration_bounds = array<i64: 1>, scalar_prefetch = 0 : i64, scratch_operands = 0 : i64, tpu.core_type = #tpu.core_type<tc>, window_params = [{transform_indices = @transform_0, window_bounds = array<i64: 1, 8, 128>}, {pipeline_mode = #tpu.pipeline_mode<synchronous>, transform_indices = @transform_1, window_bounds = array<i64: 8, 128>}, {transform_indices = @transform_2, window_bounds = array<i64: 1024, 128>}]} {
    %c0 = arith.constant 0 : index
    %c0_0 = arith.constant 0 : index
    %0 = vector.load %arg2[%c0, %c0_0] : memref<8x128xf32, #tpu.memory_space<vmem>>, vector<8x128xf32>
    %c0_1 = arith.constant 0 : index
    %c0_2 = arith.constant 0 : index
    %c0_3 = arith.constant 0 : index
    %1 = vector.load %arg1[%c0_1, %c0_2, %c0_3] : memref<1x8x128xi32, #tpu.memory_space<vmem>>, vector<1x8x128xi32>
    %2 = vector.shape_cast %1 : vector<1x8x128xi32> to vector<8x128xi32>
    %c100_i32 = arith.constant 100 : i32
    %3 = vector.broadcast %c100_i32 : i32 to vector<8x128xi32>
    %4 = arith.subi %2, %3 : vector<8x128xi32>
    %5 = tpu.iota {dimensions = array<i32: 0>} : vector<8x128xi32>
    %6 = vector.extract_strided_slice %4 {offsets = [0, 0], sizes = [1, 128], strides = [1, 1]} : vector<8x128xi32> to vector<1x128xi32>
    %7 = vector.broadcast %6 : vector<1x128xi32> to vector<8x128xi32>
    %8 = arith.cmpi eq, %5, %7 : vector<8x128xi32>
    %9 = arith.extui %8 : vector<8x128xi1> to vector<8x128xi32>
    %10 = arith.sitofp %9 : vector<8x128xi32> to vector<8x128xf32>
    %cst = arith.constant dense<0.000000e+00> : vector<128x128xf32>
    %11 = tpu.matmul %10, %0, %cst {dimension_numbers = #tpu.dot_dimension_numbers<[0], [0], [1], [1], [0, 1, 1, 1], [], []>} : vector<8x128xf32>, vector<8x128xf32>, vector<128x128xf32> -> vector<128x128xf32>
    %c0_4 = arith.constant 0 : index
    %c0_5 = arith.constant 0 : index
    %12 = vector.load %arg3[%c0_4, %c0_5] : memref<1024x128xf32, #tpu.memory_space<vmem>>, vector<128x128xf32>
    tpu.vector_store %arg3[%c0_4, %c0_5], %11 {strides = array<i32>} : memref<1024x128xf32, #tpu.memory_space<vmem>>, vector<128x128xf32>,
    %13 = vector.extract_strided_slice %4 {offsets = [1, 0], sizes = [1, 128], strides = [1, 1]} : vector<8x128xi32> to vector<1x128xi32>
    %14 = vector.broadcast %13 : vector<1x128xi32> to vector<8x128xi32>
    %15 = arith.cmpi eq, %5, %14 : vector<8x128xi32>
    %16 = arith.extui %15 : vector<8x128xi1> to vector<8x128xi32>
    %17 = arith.sitofp %16 : vector<8x128xi32> to vector<8x128xf32>
    %cst_6 = arith.constant dense<0.000000e+00> : vector<128x128xf32>
    %18 = tpu.matmul %17, %0, %cst_6 {dimension_numbers = #tpu.dot_dimension_numbers<[0], [0], [1], [1], [0, 1, 1, 1], [], []>} : vector<8x128xf32>, vector<8x128xf32>, vector<128x128xf32> -> vector<128x128xf32>
    %c128 = arith.constant 128 : index
    %c0_7 = arith.constant 0 : index
    %19 = vector.load %arg3[%c128, %c0_7] : memref<1024x128xf32, #tpu.memory_space<vmem>>, vector<128x128xf32>
    tpu.vector_store %arg3[%c128, %c0_7], %18 {strides = array<i32>} : memref<1024x128xf32, #tpu.memory_space<vmem>>, vector<128x128xf32>,
    %20 = vector.extract_strided_slice %4 {offsets = [2, 0], sizes = [1, 128], strides = [1, 1]} : vector<8x128xi32> to vector<1x128xi32>
    %21 = vector.broadcast %20 : vector<1x128xi32> to vector<8x128xi32>
    %22 = arith.cmpi eq, %5, %21 : vector<8x128xi32>
    %23 = arith.extui %22 : vector<8x128xi1> to vector<8x128xi32>
    %24 = arith.sitofp %23 : vector<8x128xi32> to vector<8x128xf32>
    %cst_8 = arith.constant dense<0.000000e+00> : vector<128x128xf32>
    %25 = tpu.matmul %24, %0, %cst_8 {dimension_numbers = #tpu.dot_dimension_numbers<[0], [0], [1], [1], [0, 1, 1, 1], [], []>} : vector<8x128xf32>, vector<8x128xf32>, vector<128x128xf32> -> vector<128x128xf32>
    %c256 = arith.constant 256 : index
    %c0_9 = arith.constant 0 : index
    %26 = vector.load %arg3[%c256, %c0_9] : memref<1024x128xf32, #tpu.memory_space<vmem>>, vector<128x128xf32>
    tpu.vector_store %arg3[%c256, %c0_9], %25 {strides = array<i32>} : memref<1024x128xf32, #tpu.memory_space<vmem>>, vector<128x128xf32>,
    %27 = vector.extract_strided_slice %4 {offsets = [3, 0], sizes = [1, 128], strides = [1, 1]} : vector<8x128xi32> to vector<1x128xi32>
    %28 = vector.broadcast %27 : vector<1x128xi32> to vector<8x128xi32>
    %29 = arith.cmpi eq, %5, %28 : vector<8x128xi32>
    %30 = arith.extui %29 : vector<8x128xi1> to vector<8x128xi32>
    %31 = arith.sitofp %30 : vector<8x128xi32> to vector<8x128xf32>
    %cst_10 = arith.constant dense<0.000000e+00> : vector<128x128xf32>
    %32 = tpu.matmul %31, %0, %cst_10 {dimension_numbers = #tpu.dot_dimension_numbers<[0], [0], [1], [1], [0, 1, 1, 1], [], []>} : vector<8x128xf32>, vector<8x128xf32>, vector<128x128xf32> -> vector<128x128xf32>
    %c384 = arith.constant 384 : index
    %c0_11 = arith.constant 0 : index
    %33 = vector.load %arg3[%c384, %c0_11] : memref<1024x128xf32, #tpu.memory_space<vmem>>, vector<128x128xf32>
    tpu.vector_store %arg3[%c384, %c0_11], %32 {strides = array<i32>} : memref<1024x128xf32, #tpu.memory_space<vmem>>, vector<128x128xf32>,
    %34 = vector.extract_strided_slice %4 {offsets = [4, 0], sizes = [1, 128], strides = [1, 1]} : vector<8x128xi32> to vector<1x128xi32>
    %35 = vector.broadcast %34 : vector<1x128xi32> to vector<8x128xi32>
    %36 = arith.cmpi eq, %5, %35 : vector<8x128xi32>
    %37 = arith.extui %36 : vector<8x128xi1> to vector<8x128xi32>
    %38 = arith.sitofp %37 : vector<8x128xi32> to vector<8x128xf32>
    %cst_12 = arith.constant dense<0.000000e+00> : vector<128x128xf32>
    %39 = tpu.matmul %38, %0, %cst_12 {dimension_numbers = #tpu.dot_dimension_numbers<[0], [0], [1], [1], [0, 1, 1, 1], [], []>} : vector<8x128xf32>, vector<8x128xf32>, vector<128x128xf32> -> vector<128x128xf32>
    %c512 = arith.constant 512 : index
    %c0_13 = arith.constant 0 : index
    %40 = vector.load %arg3[%c512, %c0_13] : memref<1024x128xf32, #tpu.memory_space<vmem>>, vector<128x128xf32>
    tpu.vector_store %arg3[%c512, %c0_13], %39 {strides = array<i32>} : memref<1024x128xf32, #tpu.memory_space<vmem>>, vector<128x128xf32>,
    %41 = vector.extract_strided_slice %4 {offsets = [5, 0], sizes = [1, 128], strides = [1, 1]} : vector<8x128xi32> to vector<1x128xi32>
    %42 = vector.broadcast %41 : vector<1x128xi32> to vector<8x128xi32>
    %43 = arith.cmpi eq, %5, %42 : vector<8x128xi32>
    %44 = arith.extui %43 : vector<8x128xi1> to vector<8x128xi32>
    %45 = arith.sitofp %44 : vector<8x128xi32> to vector<8x128xf32>
    %cst_14 = arith.constant dense<0.000000e+00> : vector<128x128xf32>
    %46 = tpu.matmul %45, %0, %cst_14 {dimension_numbers = #tpu.dot_dimension_numbers<[0], [0], [1], [1], [0, 1, 1, 1], [], []>} : vector<8x128xf32>, vector<8x128xf32>, vector<128x128xf32> -> vector<128x128xf32>
    %c640 = arith.constant 640 : index
    %c0_15 = arith.constant 0 : index
    %47 = vector.load %arg3[%c640, %c0_15] : memref<1024x128xf32, #tpu.memory_space<vmem>>, vector<128x128xf32>
    tpu.vector_store %arg3[%c640, %c0_15], %46 {strides = array<i32>} : memref<1024x128xf32, #tpu.memory_space<vmem>>, vector<128x128xf32>,
    %48 = vector.extract_strided_slice %4 {offsets = [6, 0], sizes = [1, 128], strides = [1, 1]} : vector<8x128xi32> to vector<1x128xi32>
    %49 = vector.broadcast %48 : vector<1x128xi32> to vector<8x128xi32>
    %50 = arith.cmpi eq, %5, %49 : vector<8x128xi32>
    %51 = arith.extui %50 : vector<8x128xi1> to vector<8x128xi32>
    %52 = arith.sitofp %51 : vector<8x128xi32> to vector<8x128xf32>
    %cst_16 = arith.constant dense<0.000000e+00> : vector<128x128xf32>
    %53 = tpu.matmul %52, %0, %cst_16 {dimension_numbers = #tpu.dot_dimension_numbers<[0], [0], [1], [1], [0, 1, 1, 1], [], []>} : vector<8x128xf32>, vector<8x128xf32>, vector<128x128xf32> -> vector<128x128xf32>
    %c768 = arith.constant 768 : index
    %c0_17 = arith.constant 0 : index
    %54 = vector.load %arg3[%c768, %c0_17] : memref<1024x128xf32, #tpu.memory_space<vmem>>, vector<128x128xf32>
    tpu.vector_store %arg3[%c768, %c0_17], %53 {strides = array<i32>} : memref<1024x128xf32, #tpu.memory_space<vmem>>, vector<128x128xf32>,
    %55 = vector.extract_strided_slice %4 {offsets = [7, 0], sizes = [1, 128], strides = [1, 1]} : vector<8x128xi32> to vector<1x128xi32>
    %56 = vector.broadcast %55 : vector<1x128xi32> to vector<8x128xi32>
    %57 = arith.cmpi eq, %5, %56 : vector<8x128xi32>
    %58 = arith.extui %57 : vector<8x128xi1> to vector<8x128xi32>
    %59 = arith.sitofp %58 : vector<8x128xi32> to vector<8x128xf32>
    %cst_18 = arith.constant dense<0.000000e+00> : vector<128x128xf32>
    %60 = tpu.matmul %59, %0, %cst_18 {dimension_numbers = #tpu.dot_dimension_numbers<[0], [0], [1], [1], [0, 1, 1, 1], [], []>} : vector<8x128xf32>, vector<8x128xf32>, vector<128x128xf32> -> vector<128x128xf32>
    %c896 = arith.constant 896 : index
    %c0_19 = arith.constant 0 : index
    %61 = vector.load %arg3[%c896, %c0_19] : memref<1024x128xf32, #tpu.memory_space<vmem>>, vector<128x128xf32>
    tpu.vector_store %arg3[%c896, %c0_19], %60 {strides = array<i32>} : memref<1024x128xf32, #tpu.memory_space<vmem>>, vector<128x128xf32>,
    return
  }
  func.func @transform_0(%arg0: i32) -> (i32, i32, i32) {
    %c0_i32 = arith.constant 0 : i32
    %c0_i32_0 = arith.constant 0 : i32
    %c0_i32_1 = arith.constant 0 : i32
    return %arg0, %c0_i32, %c0_i32_0 : i32, i32, i32
  }
  func.func @transform_1(%arg0: i32) -> (i32, i32) {
    %c0_i32 = arith.constant 0 : i32
    %c0_i32_0 = arith.constant 0 : i32
    %c0_i32_1 = arith.constant 0 : i32
    return %c0_i32, %c0_i32_0 : i32, i32
  }
  func.func @transform_2(%arg0: i32) -> (i32, i32) {
    %c0_i32 = arith.constant 0 : i32
    %c0_i32_0 = arith.constant 0 : i32
    return %arg0, %c0_i32 : i32, i32
  }
}

</mosaic_0001>

<bundles_post_ra>
// kernel: tpu_custom_call.1
= control target key start
LH: loop header
LB: loop body
LE: loop exit
PB: predicated region body
PF: predicated region fallthrough
CT: control target
= control target key end

     0   :  { %7 = vsyncpa [#allocation3], 0  ;;  %s3262_s0 = inlined_call_operand.hbm [shape: s32[1,8,128], index: 0, kind: input, shape index: {}]   ;;  %s3263_s1 = inlined_call_operand.hbm [shape: f32[8,128], index: 1, kind: input, shape index: {}]   ;;  %s3264_s2 = inlined_call_operand.hbm [shape: f32[16,128], index: 2, kind: output, shape index: {}]  }
   0x1   :  { %8 = vsyncpa [#allocation6], 0 }
   0x2   :  { %9 = vsyncpa [#allocation4], 0  ;;  %s2931_s9 = smov [#allocation2]   ;;  %s2932_s11 = smov [#allocation5]  }
   0x3   :  { %s16_s10 = sshll.u32 %s2931_s9, 4  ;;  %s26_s12 = sshll.u32 %s2932_s11, 4  ;;  %s17_s10 = int_to_ptr.vmem [resolvable:$true] %s16_s10  ;;  %s27_s12 = int_to_ptr.vmem [resolvable:$true] %s26_s12 }
   0x4   :  { %s2859_s15 = scalar_lea.hbm %s3262_s0, 128 }
   0x5   :  { %p2860_p0 = scmp.ne.s32.totalorder %s3262_s0, %s2859_s15  ;;  %p2863_p1 = scmp.lt.u32.totalorder %s2859_s15, %s3262_s0 }
   0x7   :  { %p2865_p2 = pnand %p2863_p1, %p2860_p0 }
   0x9   :  { %2868 = shalt.err (!%p2865_p2)
}
   0xa   :  { %s2869_s20 = scalar_lea.vmem %s17_s10, 128  ;;  %p2874_p4 = scmp.lt.s32.totalorder %s17_s10, %s17_s10 }
   0xb   :  { %p2870_p3 = scmp.ne.s32.totalorder %s17_s10, %s2869_s20  ;;  %p2875_p5 = scmp.lt.s32.totalorder %s2869_s20, %s2869_s20 }
   0xd   :  { %p2876_p6 = por %p2875_p5, %p2874_p4 }
   0xf   :  { %p2877_p7 = pnand %p2876_p6, %p2870_p3 }
  0x11   :  { %2880 = shalt.err (!%p2877_p7)
}
  0x12   :  { %19 = dma.hbm_to_vmem [thread:$0]  %s3262_s0, 128, %s17_s10, [#allocation3]  }
  0x13   :  { %s2881_s25 = scalar_lea.hbm %s3263_s1, 128 }
  0x14   :  { %p2882_p8 = scmp.ne.s32.totalorder %s3263_s1, %s2881_s25  ;;  %p2885_p9 = scmp.lt.u32.totalorder %s2881_s25, %s3263_s1 }
  0x16   :  { %p2887_p10 = pnand %p2885_p9, %p2882_p8 }
  0x18   :  { %2890 = shalt.err (!%p2887_p10)
}
  0x19   :  { %s2891_s30 = scalar_lea.vmem %s27_s12, 128  ;;  %p2896_p12 = scmp.lt.s32.totalorder %s27_s12, %s27_s12 }
  0x1a   :  { %p2892_p11 = scmp.ne.s32.totalorder %s27_s12, %s2891_s30  ;;  %p2897_p13 = scmp.lt.s32.totalorder %s2891_s30, %s2891_s30 }
  0x1c   :  { %p2898_p0 = por %p2897_p13, %p2896_p12 }
  0x1e   :  { %p2899_p1 = pnand %p2898_p0, %p2892_p11 }
  0x20   :  { %2902 = shalt.err (!%p2899_p1)
}
  0x21   :  { %29 = dma.hbm_to_vmem [thread:$0]  %s3263_s1, 128, %s27_s12, [#allocation6]  }
  0x22   :  { %2925 = dma.done.wait [#allocation3], 128  }
  0x23   :  { %2926 = vsyncadd [#allocation3], 4294967168 }
  0x24   :  { %2927 = dma.done.wait [#allocation6], 128  }
  0x25   :  { %2928 = vsyncadd [#allocation6], 4294967168  ;;  %v39_v0 = vlaneseq  ;;  %v37_v6 = vld [vmem:[#allocation2] sm:$0xff]  ;;  %v2933_v12 = vmov 0.0   ;;  %v2976_v19 = vld [vmem:[#allocation5] sm:$0xff]  ;;  %vm80_vm8 = vcmask 64512  }
  0x26   :  { %v2044_v7 = vadd.s32 4294967196, %v37_v6  ;;  %2317 = vmatprep.subr.mxu0 %v2976_v19  ;;  %2343 = vmatprep.subr.mxu1 %v2976_v19 }
  0x27   :  { %v40_v1 = vshrl.u32 %v39_v0, 7  ;;  %2318 = vmatpush3.msra.mxu0 %v2976_v19  ;;  %2344 = vmatpush3.msra.mxu1 %v2976_v19 }
  0x28   :  { %2369 = vmatprep.subr.mxu0 %v2976_v19  ;;  %2395 = vmatprep.subr.mxu1 %v2976_v19 }
  0x29   :  { %v43_v2 = vsub.s32 0, %v40_v1  ;;  %v292_v3 = vsub.s32 1, %v40_v1  ;;  %v1036_v4 = vsub.s32 4, %v40_v1  ;;  %v1284_v5 = vsub.s32 5, %v40_v1 }
  0x2a   :  { %v540_v20 = vsub.s32 2, %v40_v1  ;;  %v788_v21 = vsub.s32 3, %v40_v1  ;;  %v1532_v22 = vsub.s32 6, %v40_v1  ;;  %v1780_v23 = vsub.s32 7, %v40_v1 }
  0x2b   :  { %v44_v8 = vrot.slane %v2044_v7, %v43_v2  ;;  %v293_v9 = vrot.slane %v2044_v7, %v292_v3  ;;  %v1037_v10 = vrot.slane %v2044_v7, %v1036_v4  ;;  %v1285_v11 = vrot.slane %v2044_v7, %v1284_v5 }
  0x2c   :  { %v541_v24 = vrot.slane %v2044_v7, %v540_v20  ;;  %v789_v25 = vrot.slane %v2044_v7, %v788_v21  ;;  %v1533_v26 = vrot.slane %v2044_v7, %v1532_v22  ;;  %v1781_v27 = vrot.slane %v2044_v7, %v1780_v23 }
  0x2d   :  { %vm45_vm0 = vcmp.eq.s32.totalorder %v40_v1, %v44_v8  ;;  %vm294_vm1 = vcmp.eq.s32.totalorder %v40_v1, %v293_v9  ;;  %vm1038_vm2 = vcmp.eq.s32.totalorder %v40_v1, %v1037_v10  ;;  %vm1286_vm3 = vcmp.eq.s32.totalorder %v40_v1, %v1285_v11 }
  0x2e   :  { %v2045_v13 = vsel %vm45_vm0, 1.0, %v2933_v12  ;;  %v2062_v14 = vsel %vm294_vm1, 1.0, %v2933_v12  ;;  %v2113_v15 = vsel %vm1038_vm2, 1.0, %v2933_v12  ;;  %v2130_v16 = vsel %vm1286_vm3, 1.0, %v2933_v12 }
  0x2f   :  { %v2531_v17 = vpack.i.bf16 %v2062_v14, %v2045_v13  ;;  %v2695_v18 = vpack.i.bf16 %v2130_v16, %v2113_v15  ;;  %vm542_vm4 = vcmp.eq.s32.totalorder %v40_v1, %v541_v24  ;;  %vm790_vm5 = vcmp.eq.s32.totalorder %v40_v1, %v789_v25 }
  0x30   :  { %vm1534_vm6 = vcmp.eq.s32.totalorder %v40_v1, %v1533_v26  ;;  %vm1782_vm7 = vcmp.eq.s32.totalorder %v40_v1, %v1781_v27  ;;  %v2079_v28 = vsel %vm542_vm4, 1.0, %v2933_v12  ;;  %v2096_v29 = vsel %vm790_vm5, 1.0, %v2933_v12 }
  0x31   :  { %2532 = vxpose.xlu0.b32.start.end [1/1] (short) %v2531_v17, 128  ;;  %2696 = vxpose.xlu1.b32.start.end [1/1] (short) %v2695_v18, 128  ;;  %v2147_v30 = vsel %vm1534_vm6, 1.0, %v2933_v12  ;;  %v2164_v31 = vsel %vm1782_vm7, 1.0, %v2933_v12  ;;  %v2613_v32 = vpack.i.bf16 %v2096_v29, %v2079_v28 }
  0x32   :  { %v2777_v33 = vpack.i.bf16 %v2164_v31, %v2147_v30 }
  0x6e   :  { %2614 = vxpose.xlu0.b32.start.end [1/1] (short) %v2613_v32, 128  ;;  %2778 = vxpose.xlu1.b32.start.end [1/1] (short) %v2777_v33, 128 }
  0xb1   :  { %v2533_v34 = vpop.trf.xlu0  ;;  %v2984_v35 = vpop.trf.xlu1 }
  0xb2   :  { %v2534_v36 = vunpack.i.l.bf16 %v2533_v34  ;;  %v2537_v37 = vunpack.i.h.bf16 %v2533_v34 }
  0xb4   :  { %2319 = vmatprep.mubr.msk.f32.mxu0 %vm80_vm8, %v2534_v36  ;;  %2345 = vmatprep.mubr.msk.f32.mxu1 %vm80_vm8, %v2537_v37 }
  0xb5   :  { %v2538_v38 = vpop.trf.xlu0  ;;  %v2988_v39 = vpop.trf.xlu1 }
  0xb6   :  { %v2542_v40 = vunpack.i.h.bf16 %v2538_v38  ;;  %v2539_v41 = vunpack.i.l.bf16 %v2538_v38 }
  0xb8   :  { %2320 = vmatmul.mubr.msk.f32.vlgmr.msra.gmra.mrb[0].mxu0 %vm80_vm8, %v2539_v41  ;;  %2346 = vmatmul.mubr.msk.f32.vlgmr.msra.gmra.mrb[0].mxu1 %vm80_vm8, %v2542_v40 }
  0xb9   :  { %v2543_v42 = vpop.trf.xlu0  ;;  %2370 = vmatpush3.msra.mxu0 %v2976_v19  ;;  %2396 = vmatpush3.msra.mxu1 %v2976_v19  ;;  %v2994_v43 = vpop.trf.xlu1 }
  0xba   :  { %v2547_v44 = vunpack.i.h.bf16 %v2543_v42  ;;  %v2544_v45 = vunpack.i.l.bf16 %v2543_v42  ;;  %2421 = vmatprep.subr.mxu0 %v2976_v19  ;;  %2447 = vmatprep.subr.mxu1 %v2976_v19 }
  0xbc   :  { %2322 = vmatprep.mubr.msk.f32.mxu0 %vm80_vm8, %v2544_v45  ;;  %2348 = vmatprep.mubr.msk.f32.mxu1 %vm80_vm8, %v2547_v44 }
  0xbd   :  { %v2548_v46 = vpop.trf.xlu0  ;;  %v3000_v47 = vpop.trf.xlu1 }
  0xbe   :  { %v2552_v48 = vunpack.i.h.bf16 %v2548_v46  ;;  %v2549_v49 = vunpack.i.l.bf16 %v2548_v46 }
  0xc0   :  { %2323 = vmatmul.mubr.msk.f32.gmra.mrb[2].mxu0 %vm80_vm8, %v2549_v49  ;;  %2349 = vmatmul.mubr.msk.f32.gmra.mrb[2].mxu1 %vm80_vm8, %v2552_v48 }
  0xc1   :  { %v2553_v50 = vpop.trf.xlu0  ;;  %v3004_v51 = vpop.trf.xlu1 }
  0xc2   :  { %v2557_v52 = vunpack.i.h.bf16 %v2553_v50  ;;  %v2554_v53 = vunpack.i.l.bf16 %v2553_v50 }
  0xc4   :  { %2325 = vmatprep.mubr.msk.f32.mxu0 %vm80_vm8, %v2554_v53  ;;  %2351 = vmatprep.mubr.msk.f32.mxu1 %vm80_vm8, %v2557_v52 }
  0xc5   :  { %v2558_v54 = vpop.trf.xlu0  ;;  %v3008_v55 = vpop.trf.xlu1 }
  0xc6   :  { %v2562_v56 = vunpack.i.h.bf16 %v2558_v54  ;;  %v2559_v57 = vunpack.i.l.bf16 %v2558_v54 }
  0xc8   :  { %2326 = vmatmul.mubr.msk.f32.gmra.mrb[4].mxu0 %vm80_vm8, %v2559_v57  ;;  %2352 = vmatmul.mubr.msk.f32.gmra.mrb[4].mxu1 %vm80_vm8, %v2562_v56 }
  0xc9   :  { %v2563_v58 = vpop.trf.xlu0  ;;  %v3012_v59 = vpop.trf.xlu1 }
  0xca   :  { %v2567_v60 = vunpack.i.h.bf16 %v2563_v58  ;;  %v2564_v61 = vunpack.i.l.bf16 %v2563_v58 }
  0xcc   :  { %2328 = vmatprep.mubr.msk.f32.mxu0 %vm80_vm8, %v2564_v61  ;;  %2354 = vmatprep.mubr.msk.f32.mxu1 %vm80_vm8, %v2567_v60 }
  0xcd   :  { %v2568_v62 = vpop.trf.xlu0  ;;  %v3016_v63 = vpop.trf.xlu1 }
  0xce   :  { %v2572_v0 = vunpack.i.h.bf16 %v2568_v62  ;;  %v2569_v1 = vunpack.i.l.bf16 %v2568_v62 }
  0xd0   :  { %2329 = vmatmul.mubr.msk.f32.gmra.mrb[6].mxu0 %vm80_vm8, %v2569_v1  ;;  %2355 = vmatmul.mubr.msk.f32.gmra.mrb[6].mxu1 %vm80_vm8, %v2572_v0 }
  0xd1   :  { %v2573_v2 = vpop.trf.xlu0  ;;  %v3020_v3 = vpop.trf.xlu1 }
  0xd2   :  { %v2577_v4 = vunpack.i.h.bf16 %v2573_v2  ;;  %v2574_v5 = vunpack.i.l.bf16 %v2573_v2 }
  0xd4   :  { %2331 = vmatprep.mubr.msk.f32.mxu0 %vm80_vm8, %v2574_v5  ;;  %2357 = vmatprep.mubr.msk.f32.mxu1 %vm80_vm8, %v2577_v4 }
  0xd5   :  { %v2578_v6 = vpop.trf.xlu0  ;;  %v3024_v7 = vpop.trf.xlu1 }
  0xd6   :  { %v2582_v8 = vunpack.i.h.bf16 %v2578_v6  ;;  %v2579_v9 = vunpack.i.l.bf16 %v2578_v6 }
  0xd8   :  { %2332 = vmatmul.mubr.msk.f32.gmra.mrb[8].mxu0 %vm80_vm8, %v2579_v9  ;;  %2358 = vmatmul.mubr.msk.f32.gmra.mrb[8].mxu1 %vm80_vm8, %v2582_v8 }
  0xd9   :  { %v2583_v10 = vpop.trf.xlu0  ;;  %v3028_v11 = vpop.trf.xlu1 }
  0xda   :  { %v2587_v12 = vunpack.i.h.bf16 %v2583_v10  ;;  %v2584_v13 = vunpack.i.l.bf16 %v2583_v10 }
  0xdc   :  { %2334 = vmatprep.mubr.msk.f32.mxu0 %vm80_vm8, %v2584_v13  ;;  %2360 = vmatprep.mubr.msk.f32.mxu1 %vm80_vm8, %v2587_v12 }
  0xdd   :  { %v2588_v14 = vpop.trf.xlu0  ;;  %v3032_v15 = vpop.trf.xlu1 }
  0xde   :  { %v2592_v16 = vunpack.i.h.bf16 %v2588_v14  ;;  %v2589_v17 = vunpack.i.l.bf16 %v2588_v14 }
  0xe0   :  { %2335 = vmatmul.mubr.msk.f32.gmra.mrb[10].mxu0 %vm80_vm8, %v2589_v17  ;;  %2361 = vmatmul.mubr.msk.f32.gmra.mrb[10].mxu1 %vm80_vm8, %v2592_v16 }
  0xe1   :  { %v2593_v18 = vpop.trf.xlu0  ;;  %v3036_v20 = vpop.trf.xlu1 }
  0xe2   :  { %v2597_v21 = vunpack.i.h.bf16 %v2593_v18  ;;  %v2594_v22 = vunpack.i.l.bf16 %v2593_v18 }
  0xe4   :  { %2337 = vmatprep.mubr.msk.f32.mxu0 %vm80_vm8, %v2594_v22  ;;  %2363 = vmatprep.mubr.msk.f32.mxu1 %vm80_vm8, %v2597_v21 }
  0xe5   :  { %v2598_v23 = vpop.trf.xlu0  ;;  %v3040_v24 = vpop.trf.xlu1 }
  0xe6   :  { %v2602_v25 = vunpack.i.h.bf16 %v2598_v23  ;;  %v2599_v26 = vunpack.i.l.bf16 %v2598_v23 }
  0xe8   :  { %2338 = vmatmul.mubr.msk.f32.gmra.mrb[12].mxu0 %vm80_vm8, %v2599_v26  ;;  %2364 = vmatmul.mubr.msk.f32.gmra.mrb[12].mxu1 %vm80_vm8, %v2602_v25 }
  0xe9   :  { %v2603_v27 = vpop.trf.xlu0  ;;  %v3044_v28 = vpop.trf.xlu1 }
  0xea   :  { %v2607_v29 = vunpack.i.h.bf16 %v2603_v27  ;;  %v2604_v30 = vunpack.i.l.bf16 %v2603_v27 }
  0xec   :  { %2340 = vmatprep.mubr.msk.f32.mxu0 %vm80_vm8, %v2604_v30  ;;  %2366 = vmatprep.mubr.msk.f32.mxu1 %vm80_vm8, %v2607_v29 }
  0xed   :  { %v2608_v31 = vpop.trf.xlu0  ;;  %v3048_v32 = vpop.trf.xlu1 }
  0xee   :  { %v2612_v33 = vunpack.i.h.bf16 %v2608_v31  ;;  %v2609_v34 = vunpack.i.l.bf16 %v2608_v31 }
  0xf0   :  { %2341 = vmatmul.mubr.msk.f32.gmra.mrb[14].mxu0 %vm80_vm8, %v2609_v34  ;;  %2367 = vmatmul.mubr.msk.f32.gmra.mrb[14].mxu1 %vm80_vm8, %v2612_v33 }
  0xf1   :  { %v2615_v36 = vpop.trf.xlu0  ;;  %v3052_v37 = vpop.trf.xlu1 }
  0xf2   :  { %v2619_v38 = vunpack.i.h.bf16 %v2615_v36  ;;  %v2616_v40 = vunpack.i.l.bf16 %v2615_v36 }
  0xf4   :  { %2371 = vmatprep.mubr.msk.f32.mxu0 %vm80_vm8, %v2616_v40  ;;  %2397 = vmatprep.mubr.msk.f32.mxu1 %vm80_vm8, %v2619_v38 }
  0xf5   :  { %v2620_v41 = vpop.trf.xlu0  ;;  %v3056_v42 = vpop.trf.xlu1 }
  0xf6   :  { %v2624_v44 = vunpack.i.h.bf16 %v2620_v41  ;;  %v2621_v45 = vunpack.i.l.bf16 %v2620_v41 }
  0xf8   :  { %2372 = vmatmul.mubr.msk.f32.vlgmr.msra.gmra.mrb[16].mxu0 %vm80_vm8, %v2621_v45  ;;  %2398 = vmatmul.mubr.msk.f32.vlgmr.msra.gmra.mrb[16].mxu1 %vm80_vm8, %v2624_v44 }
  0xf9   :  { %v2625_v46 = vpop.trf.xlu0  ;;  %2422 = vmatpush3.msra.mxu0 %v2976_v19  ;;  %2448 = vmatpush3.msra.mxu1 %v2976_v19  ;;  %v3062_v48 = vpop.trf.xlu1 }
  0xfa   :  { %v2629_v49 = vunpack.i.h.bf16 %v2625_v46  ;;  %v2626_v50 = vunpack.i.l.bf16 %v2625_v46  ;;  %2473 = vmatprep.subr.mxu0 %v2976_v19  ;;  %2499 = vmatprep.subr.mxu1 %v2976_v19 }
  0xfc   :  { %2374 = vmatprep.mubr.msk.f32.mxu0 %vm80_vm8, %v2626_v50  ;;  %2400 = vmatprep.mubr.msk.f32.mxu1 %vm80_vm8, %v2629_v49 }
  0xfd   :  { %v2630_v52 = vpop.trf.xlu0  ;;  %v3068_v53 = vpop.trf.xlu1 }
  0xfe   :  { %v2634_v54 = vunpack.i.h.bf16 %v2630_v52  ;;  %v2631_v56 = vunpack.i.l.bf16 %v2630_v52 }
 0x100   :  { %2375 = vmatmul.mubr.msk.f32.gmra.mrb[18].mxu0 %vm80_vm8, %v2631_v56  ;;  %2401 = vmatmul.mubr.msk.f32.gmra.mrb[18].mxu1 %vm80_vm8, %v2634_v54 }
 0x101   :  { %v2635_v57 = vpop.trf.xlu0  ;;  %v3072_v58 = vpop.trf.xlu1 }
 0x102   :  { %v2639_v60 = vunpack.i.h.bf16 %v2635_v57  ;;  %v2636_v61 = vunpack.i.l.bf16 %v2635_v57 }
 0x104   :  { %2377 = vmatprep.mubr.msk.f32.mxu0 %vm80_vm8, %v2636_v61  ;;  %2403 = vmatprep.mubr.msk.f32.mxu1 %vm80_vm8, %v2639_v60 }
 0x105   :  { %v2640_v62 = vpop.trf.xlu0  ;;  %v3076_v0 = vpop.trf.xlu1 }
 0x106   :  { %v2644_v1 = vunpack.i.h.bf16 %v2640_v62  ;;  %v2641_v2 = vunpack.i.l.bf16 %v2640_v62 }
 0x108   :  { %2378 = vmatmul.mubr.msk.f32.gmra.mrb[20].mxu0 %vm80_vm8, %v2641_v2  ;;  %2404 = vmatmul.mubr.msk.f32.gmra.mrb[20].mxu1 %vm80_vm8, %v2644_v1  ;;  %v2701_v2 = vunpack.i.h.bf16 %v2984_v35 }
 0x109   :  { %v2645_v4 = vpop.trf.xlu0  ;;  %v3080_v5 = vpop.trf.xlu1 }
 0x10a   :  { %v2649_v6 = vunpack.i.h.bf16 %v2645_v4  ;;  %v2646_v8 = vunpack.i.l.bf16 %v2645_v4  ;;  %v2698_v4 = vunpack.i.l.bf16 %v2984_v35  ;;  %v2716_v35 = vunpack.i.h.bf16 %v3000_v47 }
 0x10c   :  { %2380 = vmatprep.mubr.msk.f32.mxu0 %vm80_vm8, %v2646_v8  ;;  %2406 = vmatprep.mubr.msk.f32.mxu1 %vm80_vm8, %v2649_v6  ;;  %v2706_v6 = vunpack.i.h.bf16 %v2988_v39  ;;  %v2703_v8 = vunpack.i.l.bf16 %v2988_v39  ;;  %v2721_v39 = vunpack.i.h.bf16 %v3004_v51 }
 0x10d   :  { %v2650_v9 = vpop.trf.xlu0  ;;  %v3084_v10 = vpop.trf.xlu1 }
 0x10e   :  { %v2654_v12 = vunpack.i.h.bf16 %v2650_v9  ;;  %v2651_v13 = vunpack.i.l.bf16 %v2650_v9  ;;  %v2711_v9 = vunpack.i.h.bf16 %v2994_v43 }
 0x110   :  { %2381 = vmatmul.mubr.msk.f32.gmra.mrb[22].mxu0 %vm80_vm8, %v2651_v13  ;;  %2407 = vmatmul.mubr.msk.f32.gmra.mrb[22].mxu1 %vm80_vm8, %v2654_v12  ;;  %v2708_v12 = vunpack.i.l.bf16 %v2994_v43  ;;  %v2713_v13 = vunpack.i.l.bf16 %v3000_v47  ;;  %v2718_v43 = vunpack.i.l.bf16 %v3004_v51  ;;  %v2723_v47 = vunpack.i.l.bf16 %v3008_v55 }
 0x111   :  { %v2655_v14 = vpop.trf.xlu0  ;;  %v3088_v16 = vpop.trf.xlu1  ;;  %v2736_v51 = vunpack.i.h.bf16 %v3016_v63 }
 0x112   :  { %v2659_v17 = vunpack.i.h.bf16 %v2655_v14  ;;  %v2656_v18 = vunpack.i.l.bf16 %v2655_v14  ;;  %v2731_v14 = vunpack.i.h.bf16 %v3012_v59 }
 0x114   :  { %2383 = vmatprep.mubr.msk.f32.mxu0 %vm80_vm8, %v2656_v18  ;;  %2409 = vmatprep.mubr.msk.f32.mxu1 %vm80_vm8, %v2659_v17  ;;  %v2728_v17 = vunpack.i.l.bf16 %v3012_v59  ;;  %v2733_v18 = vunpack.i.l.bf16 %v3016_v63  ;;  %v2746_v59 = vunpack.i.h.bf16 %v3024_v7  ;;  %v2748_v63 = vunpack.i.l.bf16 %v3028_v11 }
 0x115   :  { %v2660_v21 = vpop.trf.xlu0  ;;  %v3092_v22 = vpop.trf.xlu1 }
 0x116   :  { %v2664_v23 = vunpack.i.h.bf16 %v2660_v21  ;;  %v2661_v25 = vunpack.i.l.bf16 %v2660_v21  ;;  %v2741_v21 = vunpack.i.h.bf16 %v3020_v3 }
 0x118   :  { %2384 = vmatmul.mubr.msk.f32.gmra.mrb[24].mxu0 %vm80_vm8, %v2661_v25  ;;  %2410 = vmatmul.mubr.msk.f32.gmra.mrb[24].mxu1 %vm80_vm8, %v2664_v23  ;;  %v2743_v23 = vunpack.i.l.bf16 %v3024_v7  ;;  %v2751_v25 = vunpack.i.h.bf16 %v3028_v11  ;;  %v2758_v7 = vunpack.i.l.bf16 %v3036_v20  ;;  %v2766_v11 = vunpack.i.h.bf16 %v3040_v24 }
 0x119   :  { %v2665_v26 = vpop.trf.xlu0  ;;  %v3096_v27 = vpop.trf.xlu1 }
 0x11a   :  { %v2669_v29 = vunpack.i.h.bf16 %v2665_v26  ;;  %v2666_v30 = vunpack.i.l.bf16 %v2665_v26  ;;  %v2753_v26 = vunpack.i.l.bf16 %v3032_v15 }
 0x11c   :  { %2386 = vmatprep.mubr.msk.f32.mxu0 %vm80_vm8, %v2666_v30  ;;  %2412 = vmatprep.mubr.msk.f32.mxu1 %vm80_vm8, %v2669_v29  ;;  %v2761_v29 = vunpack.i.h.bf16 %v3036_v20  ;;  %v2763_v30 = vunpack.i.l.bf16 %v3040_v24  ;;  %v2776_v20 = vunpack.i.h.bf16 %v3048_v32  ;;  %v2780_v24 = vunpack.i.l.bf16 %v3052_v37 }
 0x11d   :  { %v2670_v31 = vpop.trf.xlu0  ;;  %v3100_v33 = vpop.trf.xlu1 }
 0x11e   :  { %v2674_v34 = vunpack.i.h.bf16 %v2670_v31  ;;  %v2671_v36 = vunpack.i.l.bf16 %v2670_v31  ;;  %v2771_v31 = vunpack.i.h.bf16 %v3044_v28 }
 0x120   :  { %2387 = vmatmul.mubr.msk.f32.gmra.mrb[26].mxu0 %vm80_vm8, %v2671_v36  ;;  %2413 = vmatmul.mubr.msk.f32.gmra.mrb[26].mxu1 %vm80_vm8, %v2674_v34  ;;  %v2773_v34 = vunpack.i.l.bf16 %v3048_v32  ;;  %v2783_v36 = vunpack.i.h.bf16 %v3052_v37  ;;  %v2790_v32 = vunpack.i.l.bf16 %v3062_v48  ;;  %v2798_v37 = vunpack.i.h.bf16 %v3068_v53 }
 0x121   :  { %v2675_v38 = vpop.trf.xlu0  ;;  %v3104_v40 = vpop.trf.xlu1 }
 0x122   :  { %v2679_v41 = vunpack.i.h.bf16 %v2675_v38  ;;  %v2676_v44 = vunpack.i.l.bf16 %v2675_v38  ;;  %v2785_v38 = vunpack.i.l.bf16 %v3056_v42 }
 0x124   :  { %2389 = vmatprep.mubr.msk.f32.mxu0 %vm80_vm8, %v2676_v44  ;;  %2415 = vmatprep.mubr.msk.f32.mxu1 %vm80_vm8, %v2679_v41  ;;  %v2793_v41 = vunpack.i.h.bf16 %v3062_v48  ;;  %v2795_v44 = vunpack.i.l.bf16 %v3068_v53  ;;  %v2808_v48 = vunpack.i.h.bf16 %v3076_v0  ;;  %v2810_v53 = vunpack.i.l.bf16 %v3080_v5 }
 0x125   :  { %v2680_v45 = vpop.trf.xlu0  ;;  %v3108_v46 = vpop.trf.xlu1 }
 0x126   :  { %v2684_v49 = vunpack.i.h.bf16 %v2680_v45  ;;  %v2681_v50 = vunpack.i.l.bf16 %v2680_v45  ;;  %v2803_v45 = vunpack.i.h.bf16 %v3072_v58 }
 0x128   :  { %2390 = vmatmul.mubr.msk.f32.gmra.mrb[28].mxu0 %vm80_vm8, %v2681_v50  ;;  %2416 = vmatmul.mubr.msk.f32.gmra.mrb[28].mxu1 %vm80_vm8, %v2684_v49  ;;  %v2805_v49 = vunpack.i.l.bf16 %v3076_v0  ;;  %v2813_v50 = vunpack.i.h.bf16 %v3080_v5  ;;  %v2820_v0 = vunpack.i.l.bf16 %v3088_v16  ;;  %v2828_v5 = vunpack.i.h.bf16 %v3092_v22 }
 0x129   :  { %v2685_v52 = vpop.trf.xlu0  ;;  %v3112_v54 = vpop.trf.xlu1 }
 0x12a   :  { %v2689_v56 = vunpack.i.h.bf16 %v2685_v52  ;;  %v2686_v57 = vunpack.i.l.bf16 %v2685_v52  ;;  %v2815_v52 = vunpack.i.l.bf16 %v3084_v10 }
 0x12c   :  { %2392 = vmatprep.mubr.msk.f32.mxu0 %vm80_vm8, %v2686_v57  ;;  %2418 = vmatprep.mubr.msk.f32.mxu1 %vm80_vm8, %v2689_v56  ;;  %v2823_v56 = vunpack.i.h.bf16 %v3088_v16  ;;  %v2825_v57 = vunpack.i.l.bf16 %v3092_v22  ;;  %v2838_v16 = vunpack.i.h.bf16 %v3100_v33  ;;  %v2840_v22 = vunpack.i.l.bf16 %v3104_v40 }
 0x12d   :  { %v2690_v60 = vpop.trf.xlu0  ;;  %v3116_v61 = vpop.trf.xlu1 }
 0x12e   :  { %v2694_v62 = vunpack.i.h.bf16 %v2690_v60  ;;  %v2691_v1 = vunpack.i.l.bf16 %v2690_v60  ;;  %v2833_v60 = vunpack.i.h.bf16 %v3096_v27 }
 0x130   :  { %2393 = vmatmul.mubr.msk.f32.gmra.mrb[30].mxu0 %vm80_vm8, %v2691_v1  ;;  %2419 = vmatmul.mubr.msk.f32.gmra.mrb[30].mxu1 %vm80_vm8, %v2694_v62  ;;  %v2835_v62 = vunpack.i.l.bf16 %v3100_v33  ;;  %v2843_v1 = vunpack.i.h.bf16 %v3104_v40  ;;  %v2845_v33 = vunpack.i.l.bf16 %v3108_v46  ;;  %v2858_v40 = vunpack.i.h.bf16 %v3116_v61 }
 0x131   :  { %2423 = vmatprep.mubr.msk.f32.mxu0 %vm80_vm8, %v2698_v4  ;;  %2449 = vmatprep.mubr.msk.f32.mxu1 %vm80_vm8, %v2701_v2  ;;  %v2850_v2 = vunpack.i.l.bf16 %v3112_v54  ;;  %v2848_v4 = vunpack.i.h.bf16 %v3108_v46 }
 0x134   :  { %2424 = vmatmul.mubr.msk.f32.vlgmr.msra.gmra.mrb[32].mxu0 %vm80_vm8, %v2703_v8  ;;  %2450 = vmatmul.mubr.msk.f32.vlgmr.msra.gmra.mrb[32].mxu1 %vm80_vm8, %v2706_v6  ;;  %v2855_v6 = vunpack.i.l.bf16 %v3116_v61 }
 0x135   :  { %2474 = vmatpush3.msra.mxu0 %v2976_v19  ;;  %2500 = vmatpush3.msra.mxu1 %v2976_v19  ;;  %v2726_v19 = vunpack.i.h.bf16 %v3008_v55  ;;  %v2738_v55 = vunpack.i.l.bf16 %v3020_v3  ;;  %v2756_v3 = vunpack.i.h.bf16 %v3032_v15  ;;  %v2768_v15 = vunpack.i.l.bf16 %v3044_v28 }
 0x136   :  { %2426 = vmatprep.mubr.msk.f32.mxu0 %vm80_vm8, %v2708_v12  ;;  %2452 = vmatprep.mubr.msk.f32.mxu1 %vm80_vm8, %v2711_v9  ;;  %v2788_v28 = vunpack.i.h.bf16 %v3056_v42  ;;  %v2800_v42 = vunpack.i.l.bf16 %v3072_v58  ;;  %v2818_v58 = vunpack.i.h.bf16 %v3084_v10  ;;  %v2830_v10 = vunpack.i.l.bf16 %v3096_v27 }
 0x137   :  { %v2853_v27 = vunpack.i.h.bf16 %v3112_v54 }
 0x138   :  { %2427 = vmatmul.mubr.msk.f32.gmra.mrb[34].mxu0 %vm80_vm8, %v2713_v13  ;;  %2453 = vmatmul.mubr.msk.f32.gmra.mrb[34].mxu1 %vm80_vm8, %v2716_v35 }
 0x139   :  { %2429 = vmatprep.mubr.msk.f32.mxu0 %vm80_vm8, %v2718_v43  ;;  %2455 = vmatprep.mubr.msk.f32.mxu1 %vm80_vm8, %v2721_v39 }
 0x13c   :  { %2430 = vmatmul.mubr.msk.f32.gmra.mrb[36].mxu0 %vm80_vm8, %v2723_v47  ;;  %2456 = vmatmul.mubr.msk.f32.gmra.mrb[36].mxu1 %vm80_vm8, %v2726_v19 }
 0x13d   :  { %2432 = vmatprep.mubr.msk.f32.mxu0 %vm80_vm8, %v2728_v17  ;;  %2458 = vmatprep.mubr.msk.f32.mxu1 %vm80_vm8, %v2731_v14 }
 0x140   :  { %2433 = vmatmul.mubr.msk.f32.gmra.mrb[38].mxu0 %vm80_vm8, %v2733_v18  ;;  %2459 = vmatmul.mubr.msk.f32.gmra.mrb[38].mxu1 %vm80_vm8, %v2736_v51 }
 0x141   :  { %2435 = vmatprep.mubr.msk.f32.mxu0 %vm80_vm8, %v2738_v55  ;;  %2461 = vmatprep.mubr.msk.f32.mxu1 %vm80_vm8, %v2741_v21 }
 0x144   :  { %2436 = vmatmul.mubr.msk.f32.gmra.mrb[40].mxu0 %vm80_vm8, %v2743_v23  ;;  %2462 = vmatmul.mubr.msk.f32.gmra.mrb[40].mxu1 %vm80_vm8, %v2746_v59 }
 0x145   :  { %2438 = vmatprep.mubr.msk.f32.mxu0 %vm80_vm8, %v2748_v63  ;;  %2464 = vmatprep.mubr.msk.f32.mxu1 %vm80_vm8, %v2751_v25 }
 0x148   :  { %2439 = vmatmul.mubr.msk.f32.gmra.mrb[42].mxu0 %vm80_vm8, %v2753_v26  ;;  %2465 = vmatmul.mubr.msk.f32.gmra.mrb[42].mxu1 %vm80_vm8, %v2756_v3 }
 0x149   :  { %2441 = vmatprep.mubr.msk.f32.mxu0 %vm80_vm8, %v2758_v7  ;;  %2467 = vmatprep.mubr.msk.f32.mxu1 %vm80_vm8, %v2761_v29 }
 0x14c   :  { %2442 = vmatmul.mubr.msk.f32.gmra.mrb[44].mxu0 %vm80_vm8, %v2763_v30  ;;  %2468 = vmatmul.mubr.msk.f32.gmra.mrb[44].mxu1 %vm80_vm8, %v2766_v11 }
 0x14d   :  { %2444 = vmatprep.mubr.msk.f32.mxu0 %vm80_vm8, %v2768_v15  ;;  %2470 = vmatprep.mubr.msk.f32.mxu1 %vm80_vm8, %v2771_v31 }
 0x150   :  { %2445 = vmatmul.mubr.msk.f32.gmra.mrb[46].mxu0 %vm80_vm8, %v2773_v34  ;;  %2471 = vmatmul.mubr.msk.f32.gmra.mrb[46].mxu1 %vm80_vm8, %v2776_v20 }
 0x151   :  { %2475 = vmatprep.mubr.msk.f32.mxu0 %vm80_vm8, %v2780_v24  ;;  %2501 = vmatprep.mubr.msk.f32.mxu1 %vm80_vm8, %v2783_v36 }
 0x154   :  { %2476 = vmatmul.mubr.msk.f32.vlgmr.msra.gmra.mrb[48].mxu0 %vm80_vm8, %v2785_v38  ;;  %2502 = vmatmul.mubr.msk.f32.vlgmr.msra.gmra.mrb[48].mxu1 %vm80_vm8, %v2788_v28 }
 0x155   :  { %2478 = vmatprep.mubr.msk.f32.mxu0 %vm80_vm8, %v2790_v32  ;;  %2504 = vmatprep.mubr.msk.f32.mxu1 %vm80_vm8, %v2793_v41 }
 0x158   :  { %2479 = vmatmul.mubr.msk.f32.gmra.mrb[50].mxu0 %vm80_vm8, %v2795_v44  ;;  %2505 = vmatmul.mubr.msk.f32.gmra.mrb[50].mxu1 %vm80_vm8, %v2798_v37 }
 0x159   :  { %2481 = vmatprep.mubr.msk.f32.mxu0 %vm80_vm8, %v2800_v42  ;;  %2507 = vmatprep.mubr.msk.f32.mxu1 %vm80_vm8, %v2803_v45 }
 0x15c   :  { %2482 = vmatmul.mubr.msk.f32.gmra.mrb[52].mxu0 %vm80_vm8, %v2805_v49  ;;  %2508 = vmatmul.mubr.msk.f32.gmra.mrb[52].mxu1 %vm80_vm8, %v2808_v48 }
 0x15d   :  { %2484 = vmatprep.mubr.msk.f32.mxu0 %vm80_vm8, %v2810_v53  ;;  %2510 = vmatprep.mubr.msk.f32.mxu1 %vm80_vm8, %v2813_v50 }
 0x160   :  { %2485 = vmatmul.mubr.msk.f32.gmra.mrb[54].mxu0 %vm80_vm8, %v2815_v52  ;;  %2511 = vmatmul.mubr.msk.f32.gmra.mrb[54].mxu1 %vm80_vm8, %v2818_v58 }
 0x161   :  { %2487 = vmatprep.mubr.msk.f32.mxu0 %vm80_vm8, %v2820_v0  ;;  %2513 = vmatprep.mubr.msk.f32.mxu1 %vm80_vm8, %v2823_v56 }
 0x164   :  { %2488 = vmatmul.mubr.msk.f32.gmra.mrb[56].mxu0 %vm80_vm8, %v2825_v57  ;;  %2514 = vmatmul.mubr.msk.f32.gmra.mrb[56].mxu1 %vm80_vm8, %v2828_v5 }
 0x165   :  { %2490 = vmatprep.mubr.msk.f32.mxu0 %vm80_vm8, %v2830_v10  ;;  %2516 = vmatprep.mubr.msk.f32.mxu1 %vm80_vm8, %v2833_v60 }
 0x168   :  { %2491 = vmatmul.mubr.msk.f32.gmra.mrb[58].mxu0 %vm80_vm8, %v2835_v62  ;;  %2517 = vmatmul.mubr.msk.f32.gmra.mrb[58].mxu1 %vm80_vm8, %v2838_v16 }
 0x169   :  { %2493 = vmatprep.mubr.msk.f32.mxu0 %vm80_vm8, %v2840_v22  ;;  %2519 = vmatprep.mubr.msk.f32.mxu1 %vm80_vm8, %v2843_v1 }
 0x16c   :  { %2494 = vmatmul.mubr.msk.f32.gmra.mrb[60].mxu0 %vm80_vm8, %v2845_v33  ;;  %2520 = vmatmul.mubr.msk.f32.gmra.mrb[60].mxu1 %vm80_vm8, %v2848_v4 }
 0x16d   :  { %2496 = vmatprep.mubr.msk.f32.mxu0 %vm80_vm8, %v2850_v2  ;;  %2522 = vmatprep.mubr.msk.f32.mxu1 %vm80_vm8, %v2853_v27 }
 0x170   :  { %2497 = vmatmul.mubr.msk.f32.gmra.mrb[62].mxu0 %vm80_vm8, %v2855_v6  ;;  %2523 = vmatmul.mubr.msk.f32.gmra.mrb[62].mxu1 %vm80_vm8, %v2858_v40 }
 0x18b   :  { %v2321_v54 = vpop.f32.mrb[0].mxu0  ;;  %v2347_v8 = vpop.f32.mrb[0].mxu1 }
 0x18c   :  { %275 = vst [vmem:[#allocation7 + $0x8] sm:$0xff] %v2321_v54  ;;  %523 = vst [vmem:[#allocation7 + $0x88] sm:$0xff] %v2347_v8  ;;  %v195_v46 = vpop.f32.mrb[1].mxu0  ;;  %v443_v9 = vpop.f32.mrb[1].mxu1 }
 0x18d   :  { %274 = vst [vmem:[#allocation7] sm:$0xff] %v195_v46  ;;  %522 = vst [vmem:[#allocation7 + $0x80] sm:$0xff] %v443_v9 }
 0x193   :  { %v2324_v12 = vpop.f32.mrb[2].mxu0  ;;  %v2350_v35 = vpop.f32.mrb[2].mxu1 }
 0x194   :  { %277 = vst [vmem:[#allocation7 + $0x18] sm:$0xff] %v2324_v12  ;;  %525 = vst [vmem:[#allocation7 + $0x98] sm:$0xff] %v2350_v35  ;;  %v205_v61 = vpop.f32.mrb[3].mxu0  ;;  %v453_v13 = vpop.f32.mrb[3].mxu1 }
 0x195   :  { %276 = vst [vmem:[#allocation7 + $0x10] sm:$0xff] %v205_v61  ;;  %524 = vst [vmem:[#allocation7 + $0x90] sm:$0xff] %v453_v13 }
 0x19b   :  { %v2327_v39 = vpop.f32.mrb[4].mxu0  ;;  %v2353_v43 = vpop.f32.mrb[4].mxu1 }
 0x19c   :  { %279 = vst [vmem:[#allocation7 + $0x28] sm:$0xff] %v2327_v39  ;;  %527 = vst [vmem:[#allocation7 + $0xa8] sm:$0xff] %v2353_v43  ;;  %v215_v19 = vpop.f32.mrb[5].mxu0  ;;  %v463_v47 = vpop.f32.mrb[5].mxu1 }
 0x19d   :  { %278 = vst [vmem:[#allocation7 + $0x20] sm:$0xff] %v215_v19  ;;  %526 = vst [vmem:[#allocation7 + $0xa0] sm:$0xff] %v463_v47 }
 0x1a3   :  { %v2330_v14 = vpop.f32.mrb[6].mxu0  ;;  %v2356_v17 = vpop.f32.mrb[6].mxu1 }
 0x1a4   :  { %281 = vst [vmem:[#allocation7 + $0x38] sm:$0xff] %v2330_v14  ;;  %529 = vst [vmem:[#allocation7 + $0xb8] sm:$0xff] %v2356_v17  ;;  %v225_v51 = vpop.f32.mrb[7].mxu0  ;;  %v473_v18 = vpop.f32.mrb[7].mxu1 }
 0x1a5   :  { %280 = vst [vmem:[#allocation7 + $0x30] sm:$0xff] %v225_v51  ;;  %528 = vst [vmem:[#allocation7 + $0xb0] sm:$0xff] %v473_v18 }
 0x1ab   :  { %v2333_v21 = vpop.f32.mrb[8].mxu0  ;;  %v2359_v55 = vpop.f32.mrb[8].mxu1 }
 0x1ac   :  { %283 = vst [vmem:[#allocation7 + $0x48] sm:$0xff] %v2333_v21  ;;  %531 = vst [vmem:[#allocation7 + $0xc8] sm:$0xff] %v2359_v55  ;;  %v235_v59 = vpop.f32.mrb[9].mxu0  ;;  %v483_v23 = vpop.f32.mrb[9].mxu1 }
 0x1ad   :  { %282 = vst [vmem:[#allocation7 + $0x40] sm:$0xff] %v235_v59  ;;  %530 = vst [vmem:[#allocation7 + $0xc0] sm:$0xff] %v483_v23 }
 0x1b3   :  { %v2336_v25 = vpop.f32.mrb[10].mxu0  ;;  %v2362_v63 = vpop.f32.mrb[10].mxu1 }
 0x1b4   :  { %285 = vst [vmem:[#allocation7 + $0x58] sm:$0xff] %v2336_v25  ;;  %533 = vst [vmem:[#allocation7 + $0xd8] sm:$0xff] %v2362_v63  ;;  %v245_v3 = vpop.f32.mrb[11].mxu0  ;;  %v493_v26 = vpop.f32.mrb[11].mxu1 }
 0x1b5   :  { %284 = vst [vmem:[#allocation7 + $0x50] sm:$0xff] %v245_v3  ;;  %532 = vst [vmem:[#allocation7 + $0xd0] sm:$0xff] %v493_v26 }
 0x1bb   :  { %v2339_v29 = vpop.f32.mrb[12].mxu0  ;;  %v2365_v7 = vpop.f32.mrb[12].mxu1 }
 0x1bc   :  { %287 = vst [vmem:[#allocation7 + $0x68] sm:$0xff] %v2339_v29  ;;  %535 = vst [vmem:[#allocation7 + $0xe8] sm:$0xff] %v2365_v7  ;;  %v255_v11 = vpop.f32.mrb[13].mxu0  ;;  %v503_v30 = vpop.f32.mrb[13].mxu1 }
 0x1bd   :  { %286 = vst [vmem:[#allocation7 + $0x60] sm:$0xff] %v255_v11  ;;  %534 = vst [vmem:[#allocation7 + $0xe0] sm:$0xff] %v503_v30 }
 0x1c3   :  { %v2342_v31 = vpop.f32.mrb[14].mxu0  ;;  %v2368_v15 = vpop.f32.mrb[14].mxu1 }
 0x1c4   :  { %289 = vst [vmem:[#allocation7 + $0x78] sm:$0xff] %v2342_v31  ;;  %537 = vst [vmem:[#allocation7 + $0xf8] sm:$0xff] %v2368_v15  ;;  %v265_v20 = vpop.f32.mrb[15].mxu0  ;;  %v513_v34 = vpop.f32.mrb[15].mxu1 }
 0x1c5   :  { %288 = vst [vmem:[#allocation7 + $0x70] sm:$0xff] %v265_v20  ;;  %536 = vst [vmem:[#allocation7 + $0xf0] sm:$0xff] %v513_v34 }
 0x1cb   :  { %v2373_v36 = vpop.f32.mrb[16].mxu0  ;;  %v2399_v24 = vpop.f32.mrb[16].mxu1 }
 0x1cc   :  { %771 = vst [vmem:[#allocation7 + $0x108] sm:$0xff] %v2373_v36  ;;  %1019 = vst [vmem:[#allocation7 + $0x188] sm:$0xff] %v2399_v24  ;;  %v691_v28 = vpop.f32.mrb[17].mxu0  ;;  %v939_v38 = vpop.f32.mrb[17].mxu1 }
 0x1cd   :  { %770 = vst [vmem:[#allocation7 + $0x100] sm:$0xff] %v691_v28  ;;  %1018 = vst [vmem:[#allocation7 + $0x180] sm:$0xff] %v939_v38 }
 0x1d3   :  { %v2376_v41 = vpop.f32.mrb[18].mxu0  ;;  %v2402_v32 = vpop.f32.mrb[18].mxu1 }
 0x1d4   :  { %773 = vst [vmem:[#allocation7 + $0x118] sm:$0xff] %v2376_v41  ;;  %1021 = vst [vmem:[#allocation7 + $0x198] sm:$0xff] %v2402_v32  ;;  %v701_v37 = vpop.f32.mrb[19].mxu0  ;;  %v949_v44 = vpop.f32.mrb[19].mxu1 }
 0x1d5   :  { %772 = vst [vmem:[#allocation7 + $0x110] sm:$0xff] %v701_v37  ;;  %1020 = vst [vmem:[#allocation7 + $0x190] sm:$0xff] %v949_v44 }
 0x1db   :  { %v2379_v45 = vpop.f32.mrb[20].mxu0  ;;  %v2405_v42 = vpop.f32.mrb[20].mxu1 }
 0x1dc   :  { %775 = vst [vmem:[#allocation7 + $0x128] sm:$0xff] %v2379_v45  ;;  %1023 = vst [vmem:[#allocation7 + $0x1a8] sm:$0xff] %v2405_v42  ;;  %v711_v48 = vpop.f32.mrb[21].mxu0  ;;  %v959_v49 = vpop.f32.mrb[21].mxu1 }
 0x1dd   :  { %774 = vst [vmem:[#allocation7 + $0x120] sm:$0xff] %v711_v48  ;;  %1022 = vst [vmem:[#allocation7 + $0x1a0] sm:$0xff] %v959_v49 }
 0x1e3   :  { %v2382_v50 = vpop.f32.mrb[22].mxu0  ;;  %v2408_v53 = vpop.f32.mrb[22].mxu1 }
 0x1e4   :  { %777 = vst [vmem:[#allocation7 + $0x138] sm:$0xff] %v2382_v50  ;;  %1025 = vst [vmem:[#allocation7 + $0x1b8] sm:$0xff] %v2408_v53  ;;  %v721_v58 = vpop.f32.mrb[23].mxu0  ;;  %v969_v52 = vpop.f32.mrb[23].mxu1 }
 0x1e5   :  { %776 = vst [vmem:[#allocation7 + $0x130] sm:$0xff] %v721_v58  ;;  %1024 = vst [vmem:[#allocation7 + $0x1b0] sm:$0xff] %v969_v52 }
 0x1eb   :  { %v2385_v56 = vpop.f32.mrb[24].mxu0  ;;  %v2411_v0 = vpop.f32.mrb[24].mxu1 }
 0x1ec   :  { %779 = vst [vmem:[#allocation7 + $0x148] sm:$0xff] %v2385_v56  ;;  %1027 = vst [vmem:[#allocation7 + $0x1c8] sm:$0xff] %v2411_v0  ;;  %v731_v5 = vpop.f32.mrb[25].mxu0  ;;  %v979_v57 = vpop.f32.mrb[25].mxu1 }
 0x1ed   :  { %778 = vst [vmem:[#allocation7 + $0x140] sm:$0xff] %v731_v5  ;;  %1026 = vst [vmem:[#allocation7 + $0x1c0] sm:$0xff] %v979_v57 }
 0x1f3   :  { %v2388_v60 = vpop.f32.mrb[26].mxu0  ;;  %v2414_v10 = vpop.f32.mrb[26].mxu1 }
 0x1f4   :  { %781 = vst [vmem:[#allocation7 + $0x158] sm:$0xff] %v2388_v60  ;;  %1029 = vst [vmem:[#allocation7 + $0x1d8] sm:$0xff] %v2414_v10  ;;  %v741_v16 = vpop.f32.mrb[27].mxu0  ;;  %v989_v62 = vpop.f32.mrb[27].mxu1 }
 0x1f5   :  { %780 = vst [vmem:[#allocation7 + $0x150] sm:$0xff] %v741_v16  ;;  %1028 = vst [vmem:[#allocation7 + $0x1d0] sm:$0xff] %v989_v62 }
 0x1fb   :  { %v2391_v1 = vpop.f32.mrb[28].mxu0  ;;  %v2417_v22 = vpop.f32.mrb[28].mxu1 }
 0x1fc   :  { %783 = vst [vmem:[#allocation7 + $0x168] sm:$0xff] %v2391_v1  ;;  %1031 = vst [vmem:[#allocation7 + $0x1e8] sm:$0xff] %v2417_v22  ;;  %v751_v27 = vpop.f32.mrb[29].mxu0  ;;  %v999_v2 = vpop.f32.mrb[29].mxu1 }
 0x1fd   :  { %782 = vst [vmem:[#allocation7 + $0x160] sm:$0xff] %v751_v27  ;;  %1030 = vst [vmem:[#allocation7 + $0x1e0] sm:$0xff] %v999_v2 }
 0x203   :  { %v2394_v4 = vpop.f32.mrb[30].mxu0  ;;  %v2420_v33 = vpop.f32.mrb[30].mxu1 }
 0x204   :  { %785 = vst [vmem:[#allocation7 + $0x178] sm:$0xff] %v2394_v4  ;;  %1033 = vst [vmem:[#allocation7 + $0x1f8] sm:$0xff] %v2420_v33  ;;  %v761_v40 = vpop.f32.mrb[31].mxu0  ;;  %v1009_v6 = vpop.f32.mrb[31].mxu1 }
 0x205   :  { %784 = vst [vmem:[#allocation7 + $0x170] sm:$0xff] %v761_v40  ;;  %1032 = vst [vmem:[#allocation7 + $0x1f0] sm:$0xff] %v1009_v6 }
 0x207   :  { %v2425_v54 = vpop.f32.mrb[32].mxu0  ;;  %v2451_v8 = vpop.f32.mrb[32].mxu1 }
 0x208   :  { %1267 = vst [vmem:[#allocation7 + $0x208] sm:$0xff] %v2425_v54  ;;  %1515 = vst [vmem:[#allocation7 + $0x288] sm:$0xff] %v2451_v8  ;;  %v1187_v46 = vpop.f32.mrb[33].mxu0  ;;  %v1435_v9 = vpop.f32.mrb[33].mxu1 }
 0x209   :  { %1266 = vst [vmem:[#allocation7 + $0x200] sm:$0xff] %v1187_v46  ;;  %1514 = vst [vmem:[#allocation7 + $0x280] sm:$0xff] %v1435_v9 }
 0x20b   :  { %v2428_v12 = vpop.f32.mrb[34].mxu0  ;;  %v2454_v35 = vpop.f32.mrb[34].mxu1 }
 0x20c   :  { %1269 = vst [vmem:[#allocation7 + $0x218] sm:$0xff] %v2428_v12  ;;  %1517 = vst [vmem:[#allocation7 + $0x298] sm:$0xff] %v2454_v35  ;;  %v1197_v61 = vpop.f32.mrb[35].mxu0  ;;  %v1445_v13 = vpop.f32.mrb[35].mxu1 }
 0x20d   :  { %1268 = vst [vmem:[#allocation7 + $0x210] sm:$0xff] %v1197_v61  ;;  %1516 = vst [vmem:[#allocation7 + $0x290] sm:$0xff] %v1445_v13 }
 0x20f   :  { %v2431_v39 = vpop.f32.mrb[36].mxu0  ;;  %v2457_v43 = vpop.f32.mrb[36].mxu1 }
 0x210   :  { %1271 = vst [vmem:[#allocation7 + $0x228] sm:$0xff] %v2431_v39  ;;  %1519 = vst [vmem:[#allocation7 + $0x2a8] sm:$0xff] %v2457_v43  ;;  %v1207_v19 = vpop.f32.mrb[37].mxu0  ;;  %v1455_v47 = vpop.f32.mrb[37].mxu1 }
 0x211   :  { %1270 = vst [vmem:[#allocation7 + $0x220] sm:$0xff] %v1207_v19  ;;  %1518 = vst [vmem:[#allocation7 + $0x2a0] sm:$0xff] %v1455_v47 }
 0x213   :  { %v2434_v14 = vpop.f32.mrb[38].mxu0  ;;  %v2460_v17 = vpop.f32.mrb[38].mxu1 }
 0x214   :  { %1273 = vst [vmem:[#allocation7 + $0x238] sm:$0xff] %v2434_v14  ;;  %1521 = vst [vmem:[#allocation7 + $0x2b8] sm:$0xff] %v2460_v17  ;;  %v1217_v51 = vpop.f32.mrb[39].mxu0  ;;  %v1465_v18 = vpop.f32.mrb[39].mxu1 }
 0x215   :  { %1272 = vst [vmem:[#allocation7 + $0x230] sm:$0xff] %v1217_v51  ;;  %1520 = vst [vmem:[#allocation7 + $0x2b0] sm:$0xff] %v1465_v18 }
 0x217   :  { %v2437_v21 = vpop.f32.mrb[40].mxu0  ;;  %v2463_v55 = vpop.f32.mrb[40].mxu1 }
 0x218   :  { %1275 = vst [vmem:[#allocation7 + $0x248] sm:$0xff] %v2437_v21  ;;  %1523 = vst [vmem:[#allocation7 + $0x2c8] sm:$0xff] %v2463_v55  ;;  %v1227_v59 = vpop.f32.mrb[41].mxu0  ;;  %v1475_v23 = vpop.f32.mrb[41].mxu1 }
 0x219   :  { %1274 = vst [vmem:[#allocation7 + $0x240] sm:$0xff] %v1227_v59  ;;  %1522 = vst [vmem:[#allocation7 + $0x2c0] sm:$0xff] %v1475_v23 }
 0x21b   :  { %v2440_v25 = vpop.f32.mrb[42].mxu0  ;;  %v2466_v63 = vpop.f32.mrb[42].mxu1 }
 0x21c   :  { %1277 = vst [vmem:[#allocation7 + $0x258] sm:$0xff] %v2440_v25  ;;  %1525 = vst [vmem:[#allocation7 + $0x2d8] sm:$0xff] %v2466_v63  ;;  %v1237_v3 = vpop.f32.mrb[43].mxu0  ;;  %v1485_v26 = vpop.f32.mrb[43].mxu1 }
 0x21d   :  { %1276 = vst [vmem:[#allocation7 + $0x250] sm:$0xff] %v1237_v3  ;;  %1524 = vst [vmem:[#allocation7 + $0x2d0] sm:$0xff] %v1485_v26 }
 0x21f   :  { %v2443_v29 = vpop.f32.mrb[44].mxu0  ;;  %v2469_v7 = vpop.f32.mrb[44].mxu1 }
 0x220   :  { %1279 = vst [vmem:[#allocation7 + $0x268] sm:$0xff] %v2443_v29  ;;  %1527 = vst [vmem:[#allocation7 + $0x2e8] sm:$0xff] %v2469_v7  ;;  %v1247_v11 = vpop.f32.mrb[45].mxu0  ;;  %v1495_v30 = vpop.f32.mrb[45].mxu1 }
 0x221   :  { %1278 = vst [vmem:[#allocation7 + $0x260] sm:$0xff] %v1247_v11  ;;  %1526 = vst [vmem:[#allocation7 + $0x2e0] sm:$0xff] %v1495_v30 }
 0x223   :  { %v2446_v31 = vpop.f32.mrb[46].mxu0  ;;  %v2472_v15 = vpop.f32.mrb[46].mxu1 }
 0x224   :  { %1281 = vst [vmem:[#allocation7 + $0x278] sm:$0xff] %v2446_v31  ;;  %1529 = vst [vmem:[#allocation7 + $0x2f8] sm:$0xff] %v2472_v15  ;;  %v1257_v20 = vpop.f32.mrb[47].mxu0  ;;  %v1505_v34 = vpop.f32.mrb[47].mxu1 }
 0x225   :  { %1280 = vst [vmem:[#allocation7 + $0x270] sm:$0xff] %v1257_v20  ;;  %1528 = vst [vmem:[#allocation7 + $0x2f0] sm:$0xff] %v1505_v34 }
 0x227   :  { %v2477_v36 = vpop.f32.mrb[48].mxu0  ;;  %v2503_v24 = vpop.f32.mrb[48].mxu1 }
 0x228   :  { %1763 = vst [vmem:[#allocation7 + $0x308] sm:$0xff] %v2477_v36  ;;  %2011 = vst [vmem:[#allocation7 + $0x388] sm:$0xff] %v2503_v24  ;;  %v1683_v28 = vpop.f32.mrb[49].mxu0  ;;  %v1931_v38 = vpop.f32.mrb[49].mxu1 }
 0x229   :  { %1762 = vst [vmem:[#allocation7 + $0x300] sm:$0xff] %v1683_v28  ;;  %2010 = vst [vmem:[#allocation7 + $0x380] sm:$0xff] %v1931_v38 }
 0x22b   :  { %v2480_v41 = vpop.f32.mrb[50].mxu0  ;;  %v2506_v32 = vpop.f32.mrb[50].mxu1 }
 0x22c   :  { %1765 = vst [vmem:[#allocation7 + $0x318] sm:$0xff] %v2480_v41  ;;  %2013 = vst [vmem:[#allocation7 + $0x398] sm:$0xff] %v2506_v32  ;;  %v1693_v37 = vpop.f32.mrb[51].mxu0  ;;  %v1941_v44 = vpop.f32.mrb[51].mxu1 }
 0x22d   :  { %1764 = vst [vmem:[#allocation7 + $0x310] sm:$0xff] %v1693_v37  ;;  %2012 = vst [vmem:[#allocation7 + $0x390] sm:$0xff] %v1941_v44 }
 0x22f   :  { %v2483_v45 = vpop.f32.mrb[52].mxu0  ;;  %v2509_v42 = vpop.f32.mrb[52].mxu1 }
 0x230   :  { %1767 = vst [vmem:[#allocation7 + $0x328] sm:$0xff] %v2483_v45  ;;  %2015 = vst [vmem:[#allocation7 + $0x3a8] sm:$0xff] %v2509_v42  ;;  %v1703_v48 = vpop.f32.mrb[53].mxu0  ;;  %v1951_v49 = vpop.f32.mrb[53].mxu1 }
 0x231   :  { %1766 = vst [vmem:[#allocation7 + $0x320] sm:$0xff] %v1703_v48  ;;  %2014 = vst [vmem:[#allocation7 + $0x3a0] sm:$0xff] %v1951_v49 }
 0x233   :  { %v2486_v50 = vpop.f32.mrb[54].mxu0  ;;  %v2512_v53 = vpop.f32.mrb[54].mxu1 }
 0x234   :  { %1769 = vst [vmem:[#allocation7 + $0x338] sm:$0xff] %v2486_v50  ;;  %2017 = vst [vmem:[#allocation7 + $0x3b8] sm:$0xff] %v2512_v53  ;;  %v1713_v58 = vpop.f32.mrb[55].mxu0  ;;  %v1961_v52 = vpop.f32.mrb[55].mxu1 }
 0x235   :  { %1768 = vst [vmem:[#allocation7 + $0x330] sm:$0xff] %v1713_v58  ;;  %2016 = vst [vmem:[#allocation7 + $0x3b0] sm:$0xff] %v1961_v52 }
 0x237   :  { %v2489_v56 = vpop.f32.mrb[56].mxu0  ;;  %v2515_v0 = vpop.f32.mrb[56].mxu1 }
 0x238   :  { %1771 = vst [vmem:[#allocation7 + $0x348] sm:$0xff] %v2489_v56  ;;  %2019 = vst [vmem:[#allocation7 + $0x3c8] sm:$0xff] %v2515_v0  ;;  %v1723_v5 = vpop.f32.mrb[57].mxu0  ;;  %v1971_v57 = vpop.f32.mrb[57].mxu1 }
 0x239   :  { %1770 = vst [vmem:[#allocation7 + $0x340] sm:$0xff] %v1723_v5  ;;  %2018 = vst [vmem:[#allocation7 + $0x3c0] sm:$0xff] %v1971_v57 }
 0x23b   :  { %v2492_v60 = vpop.f32.mrb[58].mxu0  ;;  %v2518_v10 = vpop.f32.mrb[58].mxu1 }
 0x23c   :  { %1773 = vst [vmem:[#allocation7 + $0x358] sm:$0xff] %v2492_v60  ;;  %2021 = vst [vmem:[#allocation7 + $0x3d8] sm:$0xff] %v2518_v10  ;;  %v1733_v16 = vpop.f32.mrb[59].mxu0  ;;  %v1981_v62 = vpop.f32.mrb[59].mxu1 }
 0x23d   :  { %1772 = vst [vmem:[#allocation7 + $0x350] sm:$0xff] %v1733_v16  ;;  %2020 = vst [vmem:[#allocation7 + $0x3d0] sm:$0xff] %v1981_v62 }
 0x23f   :  { %v2495_v1 = vpop.f32.mrb[60].mxu0  ;;  %v2521_v22 = vpop.f32.mrb[60].mxu1 }
 0x240   :  { %1775 = vst [vmem:[#allocation7 + $0x368] sm:$0xff] %v2495_v1  ;;  %2023 = vst [vmem:[#allocation7 + $0x3e8] sm:$0xff] %v2521_v22  ;;  %v1743_v27 = vpop.f32.mrb[61].mxu0  ;;  %v1991_v2 = vpop.f32.mrb[61].mxu1 }
 0x241   :  { %1774 = vst [vmem:[#allocation7 + $0x360] sm:$0xff] %v1743_v27  ;;  %2022 = vst [vmem:[#allocation7 + $0x3e0] sm:$0xff] %v1991_v2 }
 0x243   :  { %v2498_v4 = vpop.f32.mrb[62].mxu0  ;;  %v2524_v33 = vpop.f32.mrb[62].mxu1 }
 0x244   :  { %1777 = vst [vmem:[#allocation7 + $0x378] sm:$0xff] %v2498_v4  ;;  %2025 = vst [vmem:[#allocation7 + $0x3f8] sm:$0xff] %v2524_v33  ;;  %v1753_v40 = vpop.f32.mrb[63].mxu0  ;;  %v2001_v6 = vpop.f32.mrb[63].mxu1 }
 0x245   :  { %1776 = vst [vmem:[#allocation7 + $0x370] sm:$0xff] %v1753_v40  ;;  %2024 = vst [vmem:[#allocation7 + $0x3f0] sm:$0xff] %v2001_v6 }
 0x246   :  { %2030 = vsyncadd [#allocation4], 16128  ;;  %s2934_s1 = smov [#allocation7]  }
 0x247   :  { %s2031_s4 = sshll.u32 %s2934_s1, 4  ;;  %s2032_s4 = int_to_ptr.vmem [resolvable:$true] %s2031_s4 }
 0x248   :  { %s2903_s5 = scalar_lea.vmem %s2032_s4, 256  ;;  %s2907_s6 = scalar_lea.vmem %s2032_s4, 16384 }
 0x249   :  { %p2904_p2 = scmp.ne.s32.totalorder %s2032_s4, %s2903_s5  ;;  %p2908_p3 = scmp.lt.s32.totalorder %s2032_s4, %s2032_s4 }
 0x24a   :  { %p2909_p4 = scmp.lt.s32.totalorder %s2907_s6, %s2903_s5 }
 0x24c   :  { %p2910_p5 = por %p2909_p4, %p2908_p3 }
 0x24e   :  { %p2911_p6 = pnand %p2910_p5, %p2904_p2 }
 0x250   :  { %2914 = shalt.err (!%p2911_p6)
}
 0x251   :  { %s2915_s9 = scalar_lea.hbm %s3264_s2, 256 }
 0x252   :  { %p2916_p7 = scmp.ne.s32.totalorder %s3264_s2, %s2915_s9  ;;  %p2919_p8 = scmp.lt.u32.totalorder %s2915_s9, %s3264_s2 }
 0x254   :  { %p2921_p9 = pnand %p2919_p8, %p2916_p7 }
 0x256   :  { %2924 = shalt.err (!%p2921_p9)
}
 0x257   :  { %s2935_s14 = smov 128   ;;  %s2936_s15 = smov 8  }
 0x258   :  { %2037 = dma.vmem_to_hbm [thread:$0]  %s2032_s4, 256, %s3264_s2, [#allocation4], %s2935_s14, %s2935_s14, %s2936_s15  }
 0x259   :  { %2929 = dma.done.wait [#allocation4], 16384  }
 0x25a   :  { %2930 = vsyncadd [#allocation4], 4294950912 }
 0x25b   :  { %2041 = vsyncpa [#allocation3], 1 }
 0x25c   :  { %2042 = vsyncpa [#allocation6], 1 }
 0x25d   :  { %2043 = vsyncpa [#allocation4], 1 }

</bundles_post_ra>
